<compile_context>
chip_gen: v7x
topology: tpu7x:2x2x1
jax: 0.10.0
libtpu: 0.0.40
codegen_flags: <defaults>
</compile_context>

<pallas_src>
import functools

import jax
import jax.numpy as jnp
import numpy as np
from jax.experimental import pallas as pl
from jax.experimental.pallas import tpu as pltpu

# C.MINIMUM_VALUE from the reference code base (large negative fill before softmax).
MINIMUM_VALUE = -1e18


def _mlp_attention_kernel(q_ref, v_ref, mask_ref, cov_ref,
                          wq_ref, wv_ref, wc_ref, wm_ref, bm_ref,
                          out_ref, attn_ref, newcov_ref):
    bt, n, h = v_ref.shape

    q = q_ref[...]          # (Bt, H)
    v = v_ref[...]          # (Bt, N, H)
    mask = mask_ref[...]    # (Bt, N)  lane-dense
    cov = cov_ref[...]      # (Bt, N)  lane-dense

    # query_fc for all Bt queries at once: (Bt, H) @ (H, H)
    qh = jnp.dot(q, wq_ref[...], preferred_element_type=jnp.float32)          # (Bt, H)

    # value_fc as one fused GEMM: (Bt*N, H) @ (H, H)
    vh = jnp.dot(v.reshape(bt * n, h), wv_ref[...],
                 preferred_element_type=jnp.float32).reshape(bt, n, h)        # (Bt, N, H)

    # coverage_fc(cov[..., None]) is a rank-1 outer product -> VPU broadcast multiply.
    ch = cov[:, :, None] * wc_ref[...].reshape(1, 1, h)                       # (Bt, N, H)

    hid = jnp.tanh(qh[:, None, :] + vh + ch)                                  # (Bt, N, H)

    # mlp scoring ((., H) @ (H, 1)) as a lane reduction -> e stays lane-dense (Bt, N).
    e = jnp.sum(hid * wm_ref[...].reshape(1, 1, h), axis=-1) + bm_ref[0]      # (Bt, N)
    e = jnp.where(mask > 0, e, jnp.full_like(e, MINIMUM_VALUE))

    # softmax over N (lane axis)
    m = jnp.max(e, axis=-1, keepdims=True)                                    # (Bt, 1)
    p = jnp.exp(e - m)                                                        # (Bt, N)
    s = jnp.sum(p, axis=-1, keepdims=True)                                    # (Bt, 1)
    attn = p / s                                                              # (Bt, N)

    attn_ref[...] = attn
    newcov_ref[...] = cov + attn

    # context: per-batch (1, N) @ (N, H) on the MXU (batched einsum)
    ctx = jnp.einsum('bqn,bnh->bqh', attn[:, None, :], v,
                     preferred_element_type=jnp.float32)                      # (Bt, 1, H)
    out_ref[...] = ctx[:, 0, :].astype(out_ref.dtype)


def _choose_block_b(B, N):
    """Pick a batch block so the fused GEMM has ~512 rows, multiple of 8 sublanes."""
    bt = max(1, 512 // max(N, 1))
    if bt >= B:
        return B
    bt = max(8, (bt // 8) * 8)
    return B if bt >= B else bt


def prepare_params(wq, wv, wc, wm, bm):
    """One-time weight prep (outside the jitted hot path): transpose torch Linear
    weights so the kernel computes x @ W, and flatten the rank-1 projections to rows."""
    H = wq.shape[0]
    return (
        jnp.asarray(wq, jnp.float32).T,             # (H, H)
        jnp.asarray(wv, jnp.float32).T,             # (H, H)
        jnp.asarray(wc, jnp.float32).reshape(1, H),  # coverage_fc.weight (H,1) -> row
        jnp.asarray(wm, jnp.float32).reshape(1, H),  # mlp.weight        (1,H) -> row
        jnp.asarray(bm, jnp.float32).reshape(1,),    # mlp.bias scalar
    )


@jax.jit
def mlp_attention(query, value, mask, cov_vec, wq_t, wv_t, wc_row, wm_row, bm):
    """Pallas forward of MLPAttention (coverage=True path).

    query: (B, 1, H)  value: (B, N, H)  mask: (B, N)  cov_vec: (B, N)
    Weights already prepped by prepare_params().
    Returns (output (B, H), attn (B, N), new_cov (B, N)).
    """
    B, _, H = query.shape
    N = value.shape[1]

    q2d = query.reshape(B, H).astype(jnp.float32)
    v = value.astype(jnp.float32)
    mask2 = mask.astype(jnp.float32)
    cov2 = cov_vec.astype(jnp.float32)

    Bt = _choose_block_b(B, N)
    grid = (pl.cdiv(B, Bt),)

    out, attn, new_cov = pl.pallas_call(
        _mlp_attention_kernel,
        out_shape=(
            jax.ShapeDtypeStruct((B, H), jnp.float32),
            jax.ShapeDtypeStruct((B, N), jnp.float32),
            jax.ShapeDtypeStruct((B, N), jnp.float32),
        ),
        grid_spec=pltpu.PrefetchScalarGridSpec(
            num_scalar_prefetch=0,
            grid=grid,
            in_specs=[
                pl.BlockSpec((Bt, H), lambda b: (b, 0)),         # query (2D)
                pl.BlockSpec((Bt, N, H), lambda b: (b, 0, 0)),   # value
                pl.BlockSpec((Bt, N), lambda b: (b, 0)),         # mask (lane-dense)
                pl.BlockSpec((Bt, N), lambda b: (b, 0)),         # cov  (lane-dense)
                pl.BlockSpec((H, H), lambda b: (0, 0)),          # Wq^T (resident)
                pl.BlockSpec((H, H), lambda b: (0, 0)),          # Wv^T (resident)
                pl.BlockSpec((1, H), lambda b: (0, 0)),          # Wc row
                pl.BlockSpec((1, H), lambda b: (0, 0)),          # Wm row
                pl.BlockSpec(memory_space=pltpu.MemorySpace.SMEM),  # bias scalar
            ],
            out_specs=[
                pl.BlockSpec((Bt, H), lambda b: (b, 0)),         # output
                pl.BlockSpec((Bt, N), lambda b: (b, 0)),         # attn (lane-dense)
                pl.BlockSpec((Bt, N), lambda b: (b, 0)),         # new cov (lane-dense)
            ],
        ),
        compiler_params=pltpu.CompilerParams(
            dimension_semantics=("parallel",)),
    )(q2d, v, mask2, cov2, wq_t, wv_t, wc_row, wm_row, bm)

    return out, attn, new_cov


def _reference_forward(query, value, mask, cov_vec, wq, wv, wc, wm, bm):
    """Pure-JAX reference mirroring the PyTorch module (coverage path)."""
    hid = query @ wq.T + value @ wv.T + cov_vec[..., None] @ wc.T
    hid = jnp.tanh(hid)
    e = (hid @ wm.T + bm)[..., 0]
    e = jnp.where(mask > 0, e, jnp.full_like(e, MINIMUM_VALUE))
    attn = jax.nn.softmax(e, axis=-1)
    new_cov = cov_vec + attn
    out = jnp.einsum('bn,bnh->bh', attn, value)
    return out, attn, new_cov


if __name__ == "__main__":
    B, N, H = 2, 8, 32

    key = jax.random.PRNGKey(0)
    kq, kv, kc, km, kb, kx, ky, kz = jax.random.split(key, 8)

    # Deterministic synthetic parameters (torch Linear weight layouts: (out, in)).
    wq = 0.1 * jax.random.normal(kq, (H, H), jnp.float32)   # query_fc.weight
    wv = 0.1 * jax.random.normal(kv, (H, H), jnp.float32)   # value_fc.weight
    wc = 0.1 * jax.random.normal(kc, (H, 1), jnp.float32)   # coverage_fc.weight
    wm = 0.1 * jax.random.normal(km, (1, H), jnp.float32)   # mlp.weight
    bm = 0.1 * jax.random.normal(kb, (1,), jnp.float32)     # mlp.bias

    query = jax.random.normal(kx, (B, 1, H), jnp.float32)
    value = jax.random.normal(ky, (B, N, H), jnp.float32)
    cov_vec = jnp.abs(jax.random.normal(kz, (B, N), jnp.float32)) * 0.1
    # Mask out the tail of the second sequence.
    lengths = jnp.array([N, 5], jnp.int32)
    mask = (jnp.arange(N)[None, :] < lengths[:, None]).astype(jnp.float32)

    params = prepare_params(wq, wv, wc, wm, bm)   # one-time weight prep (not per-call)

    out, attn, new_cov = mlp_attention(query, value, mask, cov_vec, *params)
    jax.block_until_ready((out, attn, new_cov))

    out_r, attn_r, cov_r = _reference_forward(query, value, mask, cov_vec,
                                              wq, wv, wc, wm, bm)
    np.testing.assert_allclose(np.asarray(out), np.asarray(out_r), rtol=1e-5, atol=1e-5)
    np.testing.assert_allclose(np.asarray(attn), np.asarray(attn_r), rtol=1e-5, atol=1e-5)
    np.testing.assert_allclose(np.asarray(new_cov), np.asarray(cov_r), rtol=1e-5, atol=1e-5)

    # TODO(synk): optional bf16 cast of MXU operands for v6e/v7x left out to keep
    # bit-level parity with the f32 PyTorch reference.
    print("KERNEL_OK")
</pallas_src>

<mosaic_0001>
module attributes {stable_mosaic.version = 11 : i64} {
  func.func @_mlp_attention_kernel(%arg0: i32, %arg1: memref<2x32xf32, #tpu.memory_space<vmem>>, %arg2: memref<2x8x32xf32, #tpu.memory_space<vmem>>, %arg3: memref<2x8xf32, #tpu.memory_space<vmem>>, %arg4: memref<2x8xf32, #tpu.memory_space<vmem>>, %arg5: memref<32x32xf32, #tpu.memory_space<vmem>>, %arg6: memref<32x32xf32, #tpu.memory_space<vmem>>, %arg7: memref<1x32xf32, #tpu.memory_space<vmem>>, %arg8: memref<1x32xf32, #tpu.memory_space<vmem>>, %arg9: memref<1xf32, #tpu.memory_space<smem>>, %arg10: memref<2x32xf32, #tpu.memory_space<vmem>>, %arg11: memref<2x8xf32, #tpu.memory_space<vmem>>, %arg12: memref<2x8xf32, #tpu.memory_space<vmem>>) attributes {dimension_semantics = [#tpu.dimension_semantics<parallel>], iteration_bounds = array<i64: 1>, scalar_prefetch = 0 : i64, scratch_operands = 0 : i64, tpu.core_type = #tpu.core_type<tc>, window_params = [{transform_indices = @transform_0, window_bounds = array<i64: 2, 32>}, {transform_indices = @transform_1, window_bounds = array<i64: 2, 8, 32>}, {transform_indices = @transform_2, window_bounds = array<i64: 2, 8>}, {transform_indices = @transform_3, window_bounds = array<i64: 2, 8>}, {pipeline_mode = #tpu.pipeline_mode<synchronous>, transform_indices = @transform_4, window_bounds = array<i64: 32, 32>}, {pipeline_mode = #tpu.pipeline_mode<synchronous>, transform_indices = @transform_5, window_bounds = array<i64: 32, 32>}, {pipeline_mode = #tpu.pipeline_mode<synchronous>, transform_indices = @transform_6, window_bounds = array<i64: 1, 32>}, {pipeline_mode = #tpu.pipeline_mode<synchronous>, transform_indices = @transform_7, window_bounds = array<i64: 1, 32>}, {transform_indices = @transform_8, window_bounds = array<i64: 1>}, {transform_indices = @transform_9, window_bounds = array<i64: 2, 32>}, {transform_indices = @transform_10, window_bounds = array<i64: 2, 8>}, {transform_indices = @transform_11, window_bounds = array<i64: 2, 8>}]} {
    %c0 = arith.constant 0 : index
    %c0_0 = arith.constant 0 : index
    %0 = vector.load %arg1[%c0, %c0_0] : memref<2x32xf32, #tpu.memory_space<vmem>>, vector<2x32xf32>
    %c0_1 = arith.constant 0 : index
    %c0_2 = arith.constant 0 : index
    %c0_3 = arith.constant 0 : index
    %1 = vector.load %arg2[%c0_1, %c0_2, %c0_3] : memref<2x8x32xf32, #tpu.memory_space<vmem>>, vector<2x8x32xf32>
    %c0_4 = arith.constant 0 : index
    %c0_5 = arith.constant 0 : index
    %2 = vector.load %arg3[%c0_4, %c0_5] : memref<2x8xf32, #tpu.memory_space<vmem>>, vector<2x8xf32>
    %c0_6 = arith.constant 0 : index
    %c0_7 = arith.constant 0 : index
    %3 = vector.load %arg4[%c0_6, %c0_7] : memref<2x8xf32, #tpu.memory_space<vmem>>, vector<2x8xf32>
    %c0_8 = arith.constant 0 : index
    %c0_9 = arith.constant 0 : index
    %4 = vector.load %arg5[%c0_8, %c0_9] : memref<32x32xf32, #tpu.memory_space<vmem>>, vector<32x32xf32>
    %cst = arith.constant dense<0.000000e+00> : vector<2x32xf32>
    %5 = tpu.matmul %0, %4, %cst {dimension_numbers = #tpu.dot_dimension_numbers<[1], [0], [0], [1], [0, 0, 1, 1], [], []>} : vector<2x32xf32>, vector<32x32xf32>, vector<2x32xf32> -> vector<2x32xf32>
    %6 = vector.shape_cast %1 : vector<2x8x32xf32> to vector<16x32xf32>
    %c0_10 = arith.constant 0 : index
    %c0_11 = arith.constant 0 : index
    %7 = vector.load %arg6[%c0_10, %c0_11] : memref<32x32xf32, #tpu.memory_space<vmem>>, vector<32x32xf32>
    %cst_12 = arith.constant dense<0.000000e+00> : vector<16x32xf32>
    %8 = tpu.matmul %6, %7, %cst_12 {dimension_numbers = #tpu.dot_dimension_numbers<[1], [0], [0], [1], [0, 0, 1, 1], [], []>} : vector<16x32xf32>, vector<32x32xf32>, vector<16x32xf32> -> vector<16x32xf32>
    %9 = vector.shape_cast %8 : vector<16x32xf32> to vector<2x8x32xf32>
    %10 = vector.shape_cast %3 : vector<2x8xf32> to vector<2x8x1xf32>
    %c0_13 = arith.constant 0 : index
    %c0_14 = arith.constant 0 : index
    %11 = vector.load %arg7[%c0_13, %c0_14] : memref<1x32xf32, #tpu.memory_space<vmem>>, vector<1x32xf32>
    %12 = vector.shape_cast %11 : vector<1x32xf32> to vector<1x1x32xf32>
    %13 = vector.broadcast %10 : vector<2x8x1xf32> to vector<2x8x32xf32>
    %14 = vector.broadcast %12 : vector<1x1x32xf32> to vector<2x8x32xf32>
    %15 = arith.mulf %13, %14 : vector<2x8x32xf32>
    %16 = vector.shape_cast %5 : vector<2x32xf32> to vector<2x1x32xf32>
    %17 = vector.broadcast %16 : vector<2x1x32xf32> to vector<2x8x32xf32>
    %18 = arith.addf %17, %9 : vector<2x8x32xf32>
    %19 = arith.addf %18, %15 : vector<2x8x32xf32>
    %20 = math.tanh %19 : vector<2x8x32xf32>
    %c0_15 = arith.constant 0 : index
    %c0_16 = arith.constant 0 : index
    %21 = vector.load %arg8[%c0_15, %c0_16] : memref<1x32xf32, #tpu.memory_space<vmem>>, vector<1x32xf32>
    %22 = vector.shape_cast %21 : vector<1x32xf32> to vector<1x1x32xf32>
    %23 = vector.broadcast %22 : vector<1x1x32xf32> to vector<2x8x32xf32>
    %24 = arith.mulf %20, %23 : vector<2x8x32xf32>
    %cst_17 = arith.constant dense<0.000000e+00> : vector<2x8xf32>
    %25 = vector.multi_reduction <add>, %24, %cst_17 [2] : vector<2x8x32xf32> to vector<2x8xf32>
    %c0_18 = arith.constant 0 : index
    %26 = memref.load %arg9[%c0_18] : memref<1xf32, #tpu.memory_space<smem>>
    %27 = vector.broadcast %26 : f32 to vector<2x8xf32>
    %28 = arith.addf %25, %27 : vector<2x8xf32>
    %cst_19 = arith.constant 0.000000e+00 : f32
    %29 = vector.broadcast %cst_19 : f32 to vector<2x8xf32>
    %30 = arith.cmpf ogt, %2, %29 : vector<2x8xf32>
    %cst_20 = arith.constant -9.99999984E+17 : f32
    %31 = vector.broadcast %cst_20 : f32 to vector<2x8xf32>
    %32 = arith.select %30, %28, %31 : vector<2x8xi1>, vector<2x8xf32>
    %cst_21 = arith.constant dense<0xFF800000> : vector<2xf32>
    %33 = vector.multi_reduction <maximumf>, %32, %cst_21 [1] : vector<2x8xf32> to vector<2xf32>
    %34 = vector.shape_cast %33 : vector<2xf32> to vector<2x1xf32>
    %35 = vector.broadcast %34 : vector<2x1xf32> to vector<2x8xf32>
    %36 = arith.subf %32, %35 : vector<2x8xf32>
    %37 = math.exp %36 : vector<2x8xf32>
    %cst_22 = arith.constant dense<0.000000e+00> : vector<2xf32>
    %38 = vector.multi_reduction <add>, %37, %cst_22 [1] : vector<2x8xf32> to vector<2xf32>
    %39 = vector.shape_cast %38 : vector<2xf32> to vector<2x1xf32>
    %40 = vector.broadcast %39 : vector<2x1xf32> to vector<2x8xf32>
    %41 = arith.divf %37, %40 : vector<2x8xf32>
    %c0_23 = arith.constant 0 : index
    %c0_24 = arith.constant 0 : index
    %42 = vector.load %arg11[%c0_23, %c0_24] : memref<2x8xf32, #tpu.memory_space<vmem>>, vector<2x8xf32>
    tpu.vector_store %arg11[%c0_23, %c0_24], %41 {strides = array<i32>} : memref<2x8xf32, #tpu.memory_space<vmem>>, vector<2x8xf32>,
    %43 = arith.addf %3, %41 : vector<2x8xf32>
    %c0_25 = arith.constant 0 : index
    %c0_26 = arith.constant 0 : index
    %44 = vector.load %arg12[%c0_25, %c0_26] : memref<2x8xf32, #tpu.memory_space<vmem>>, vector<2x8xf32>
    tpu.vector_store %arg12[%c0_25, %c0_26], %43 {strides = array<i32>} : memref<2x8xf32, #tpu.memory_space<vmem>>, vector<2x8xf32>,
    %45 = vector.shape_cast %41 : vector<2x8xf32> to vector<2x1x8xf32>
    "tpu.trace_start"() <{level = 10 : i32, message = "bqn,bnh->bqh"}> : () -> ()
    %cst_27 = arith.constant dense<0.000000e+00> : vector<2x1x32xf32>
    %46 = tpu.matmul %45, %1, %cst_27 {dimension_numbers = #tpu.dot_dimension_numbers<[2], [1], [1], [2], [0, 0, 0, 1, 1, 2], [0], [0]>} : vector<2x1x8xf32>, vector<2x8x32xf32>, vector<2x1x32xf32> -> vector<2x1x32xf32>
    "tpu.trace_stop"() : () -> ()
    %47 = vector.shape_cast %46 : vector<2x1x32xf32> to vector<2x32xf32>
    %c0_28 = arith.constant 0 : index
    %c0_29 = arith.constant 0 : index
    %48 = vector.load %arg10[%c0_28, %c0_29] : memref<2x32xf32, #tpu.memory_space<vmem>>, vector<2x32xf32>
    tpu.vector_store %arg10[%c0_28, %c0_29], %47 {strides = array<i32>} : memref<2x32xf32, #tpu.memory_space<vmem>>, vector<2x32xf32>,
    return
  }
  func.func @transform_0(%arg0: i32) -> (i32, i32) {
    %c0_i32 = arith.constant 0 : i32
    %c0_i32_0 = arith.constant 0 : i32
    return %arg0, %c0_i32 : i32, i32
  }
  func.func @transform_1(%arg0: i32) -> (i32, i32, i32) {
    %c0_i32 = arith.constant 0 : i32
    %c0_i32_0 = arith.constant 0 : i32
    %c0_i32_1 = arith.constant 0 : i32
    return %arg0, %c0_i32, %c0_i32_0 : i32, i32, i32
  }
  func.func @transform_2(%arg0: i32) -> (i32, i32) {
    %c0_i32 = arith.constant 0 : i32
    %c0_i32_0 = arith.constant 0 : i32
    return %arg0, %c0_i32 : i32, i32
  }
  func.func @transform_3(%arg0: i32) -> (i32, i32) {
    %c0_i32 = arith.constant 0 : i32
    %c0_i32_0 = arith.constant 0 : i32
    return %arg0, %c0_i32 : i32, i32
  }
  func.func @transform_4(%arg0: i32) -> (i32, i32) {
    %c0_i32 = arith.constant 0 : i32
    %c0_i32_0 = arith.constant 0 : i32
    %c0_i32_1 = arith.constant 0 : i32
    return %c0_i32, %c0_i32_0 : i32, i32
  }
  func.func @transform_5(%arg0: i32) -> (i32, i32) {
    %c0_i32 = arith.constant 0 : i32
    %c0_i32_0 = arith.constant 0 : i32
    %c0_i32_1 = arith.constant 0 : i32
    return %c0_i32, %c0_i32_0 : i32, i32
  }
  func.func @transform_6(%arg0: i32) -> (i32, i32) {
    %c0_i32 = arith.constant 0 : i32
    %c0_i32_0 = arith.constant 0 : i32
    %c0_i32_1 = arith.constant 0 : i32
    return %c0_i32, %c0_i32_0 : i32, i32
  }
  func.func @transform_7(%arg0: i32) -> (i32, i32) {
    %c0_i32 = arith.constant 0 : i32
    %c0_i32_0 = arith.constant 0 : i32
    %c0_i32_1 = arith.constant 0 : i32
    return %c0_i32, %c0_i32_0 : i32, i32
  }
  func.func @transform_8(%arg0: i32) -> i32 {
    %c0_i32 = arith.constant 0 : i32
    %c0_i32_0 = arith.constant 0 : i32
    return %c0_i32 : i32
  }
  func.func @transform_9(%arg0: i32) -> (i32, i32) {
    %c0_i32 = arith.constant 0 : i32
    %c0_i32_0 = arith.constant 0 : i32
    return %arg0, %c0_i32 : i32, i32
  }
  func.func @transform_10(%arg0: i32) -> (i32, i32) {
    %c0_i32 = arith.constant 0 : i32
    %c0_i32_0 = arith.constant 0 : i32
    return %arg0, %c0_i32 : i32, i32
  }
  func.func @transform_11(%arg0: i32) -> (i32, i32) {
    %c0_i32 = arith.constant 0 : i32
    %c0_i32_0 = arith.constant 0 : i32
    return %arg0, %c0_i32 : i32, i32
  }
}

</mosaic_0001>

<bundles_post_ra>
// kernel: mlp_attention.1
= control target key start
LH: loop header
LB: loop body
LE: loop exit
PB: predicated region body
PF: predicated region fallthrough
CT: control target
= control target key end

     0   :  { %18 = vsyncpa [#allocation4], 0  ;;  %s1019_s0 = inlined_call_operand.vmem [shape: f32[2,32], index: 0, kind: input, shape index: {}]   ;;  %s1020_s1 = inlined_call_operand.hbm [shape: f32[2,8,32], index: 1, kind: input, shape index: {}]   ;;  %s1021_s2 = inlined_call_operand.vmem [shape: f32[2,8], index: 2, kind: input, shape index: {}]   ;;  %s1022_s3 = inlined_call_operand.vmem [shape: f32[2,8], index: 3, kind: input, shape index: {}]   ;;  %s1023_s4 = inlined_call_operand.hbm [shape: f32[32,32], index: 4, kind: input, shape index: {}]   ;;  %s1024_s5 = inlined_call_operand.hbm [shape: f32[32,32], index: 5, kind: input, shape index: {}]   ;;  %s1025_s6 = inlined_call_operand.vmem [shape: f32[1,32], index: 6, kind: input, shape index: {}]   ;;  %s1026_s7 = inlined_call_operand.vmem [shape: f32[1,32], index: 7, kind: input, shape index: {}]   ;;  %s1027_s8 = inlined_call_operand.<no memory space> [shape: f32[1], index: 8, kind: input, shape index: {}]   ;;  %s1028_s9 = inlined_call_operand.hbm [shape: f32[2,32], index: 9, kind: output, shape index: {0}]   ;;  %s1029_s10 = inlined_call_operand.hbm [shape: f32[2,8], index: 10, kind: output, shape index: {1}]   ;;  %s1030_s11 = inlined_call_operand.hbm [shape: f32[2,8], index: 11, kind: output, shape index: {2}]  }
   0x1   :  { %19 = vsyncpa [#allocation7], 0 }
   0x2   :  { %20 = vsyncpa [#allocation5], 0 }
   0x3   :  { %21 = vsyncpa [#allocation11], 0  ;;  %s806_s17 = smov [#allocation6]   ;;  %s807_s19 = smov [#allocation3]  }
   0x4   :  { %s45_s18 = sshll.u32 %s806_s17, 4  ;;  %s29_s20 = sshll.u32 %s807_s19, 4  ;;  %s46_s18 = int_to_ptr.vmem [resolvable:$true] %s45_s18  ;;  %s878_s20 = int_to_ptr.vmem [resolvable:$true] %s29_s20 }
   0x5   :  { %s666_s23 = scalar_lea.hbm %s1023_s4, 512 }
   0x6   :  { %p667_p0 = scmp.ne.s32.totalorder %s1023_s4, %s666_s23  ;;  %p670_p1 = scmp.lt.u32.totalorder %s666_s23, %s1023_s4 }
   0x8   :  { %p672_p2 = pnand %p670_p1, %p667_p0 }
   0xa   :  { %675 = shalt.err (!%p672_p2)
}
   0xb   :  { %s676_s28 = scalar_lea.vmem %s46_s18, 512  ;;  %p681_p4 = scmp.lt.s32.totalorder %s46_s18, %s46_s18 }
   0xc   :  { %p677_p3 = scmp.ne.s32.totalorder %s46_s18, %s676_s28  ;;  %p682_p5 = scmp.lt.s32.totalorder %s676_s28, %s676_s28 }
   0xe   :  { %p683_p6 = por %p682_p5, %p681_p4 }
  0x10   :  { %p684_p7 = pnand %p683_p6, %p677_p3 }
  0x12   :  { %687 = shalt.err (!%p684_p7)
}
  0x13   :  { %s808_s29 = smov 128   ;;  %s809_s30 = smov 8  }
  0x14   :  { %51 = dma.hbm_to_vmem [thread:$0]  %s1023_s4, 512, %s46_s18, [#allocation7], %s808_s29, %s808_s29, %s809_s30  }
  0x15   :  { %s688_s16 = scalar_lea.hbm %s1020_s1, 256 }
  0x16   :  { %p689_p8 = scmp.ne.s32.totalorder %s1020_s1, %s688_s16  ;;  %p692_p9 = scmp.lt.u32.totalorder %s688_s16, %s1020_s1 }
  0x18   :  { %p694_p10 = pnand %p692_p9, %p689_p8 }
  0x1a   :  { %697 = shalt.err (!%p694_p10)
}
  0x1b   :  { %s698_s23 = scalar_lea.vmem %s878_s20, 256  ;;  %p703_p12 = scmp.lt.s32.totalorder %s878_s20, %s878_s20 }
  0x1c   :  { %p699_p11 = scmp.ne.s32.totalorder %s878_s20, %s698_s23  ;;  %p704_p13 = scmp.lt.s32.totalorder %s698_s23, %s698_s23 }
  0x1e   :  { %p705_p0 = por %p704_p13, %p703_p12 }
  0x20   :  { %p706_p1 = pnand %p705_p0, %p699_p11 }
  0x22   :  { %709 = shalt.err (!%p706_p1)
}
  0x23   :  { %35 = dma.hbm_to_vmem [thread:$0]  %s1020_s1, 256, %s878_s20, [#allocation4], %s808_s29, %s808_s29, %s809_s30  }
  0x24   :  { %s810_s24 = smov [#allocation8]   ;;  %s710_s28 = scalar_lea.hbm %s1024_s5, 512 }
  0x25   :  { %s57_s25 = sshll.u32 %s810_s24, 4  ;;  %p711_p2 = scmp.ne.s32.totalorder %s1024_s5, %s710_s28  ;;  %s58_s25 = int_to_ptr.vmem [resolvable:$true] %s57_s25 }
  0x26   :  { %p714_p3 = scmp.lt.u32.totalorder %s710_s28, %s1024_s5 }
  0x28   :  { %p716_p4 = pnand %p714_p3, %p711_p2 }
  0x2a   :  { %719 = shalt.err (!%p716_p4)
}
  0x2b   :  { %s720_s16 = scalar_lea.vmem %s58_s25, 512  ;;  %p725_p6 = scmp.lt.s32.totalorder %s58_s25, %s58_s25 }
  0x2c   :  { %p721_p5 = scmp.ne.s32.totalorder %s58_s25, %s720_s16  ;;  %p726_p7 = scmp.lt.s32.totalorder %s720_s16, %s720_s16 }
  0x2e   :  { %p727_p8 = por %p726_p7, %p725_p6 }
  0x30   :  { %p728_p9 = pnand %p727_p8, %p721_p5 }
  0x32   :  { %731 = shalt.err (!%p728_p9)
}
  0x33   :  { %63 = dma.hbm_to_vmem [thread:$0]  %s1024_s5, 512, %s58_s25, [#allocation7], %s808_s29, %s808_s29, %s809_s30  }
  0x34   :  { %798 = dma.done.wait [#allocation4], 256  }
  0x35   :  { %799 = vsyncadd [#allocation4], 4294967040 }
  0x36   :  { %800 = dma.done.wait [#allocation7], 1024  }
  0x37   :  { %801 = vsyncadd [#allocation7], 4294966272  ;;  %v811_v0 = vmov 0.0|0.0   ;;  %vm812_vm0 = vmmov 0   ;;  %v813_v1 = vmov 0.0   ;;  %v247_v2 = vlaneseq  ;;  %v84_v4 = vld [vmem:[#allocation6] sm:$0xff] }
  0x38   :  { %632 = vmatprep.subr.bf16.mxu0 %v811_v0  ;;  %608 = vmatprep.mubr.msk.f32.mxu0 %vm812_vm0, %v813_v1  ;;  %v85_v5 = vld [vmem:[#allocation6 + $0x8] sm:$0xff]  ;;  %v162_v6 = vld [vmem:[#allocation8] sm:$0xff]  ;;  %v86_v10 = vld [vmem:[#allocation6 + $0x10] sm:$0xff]  ;;  %vm88_vm1 = vcmask 261120   ;;  %v814_v24 = vmov 1966171168   ;;  %v325_v55 = vstv %s1027_s8 }
  0x39   :  { %v932_v3 = vshrl.u32 %v247_v2, 7  ;;  %v633_v8 = vpack.c.bf16 %v85_v5, %v84_v4  ;;  %v163_v9 = vld [vmem:[#allocation8 + $0x8] sm:$0xff]  ;;  %v87_v11 = vld [vmem:[#allocation6 + $0x18] sm:$0xff]  ;;  %v164_v13 = vld [vmem:[#allocation8 + $0x10] sm:$0xff]  ;;  %v272_v25 = vunpack.c.l.s4 %v814_v24  ;;  %v332_v54 = vand.u32 127, %v247_v2 }
  0x3a   :  { %v638_v12 = vpack.c.bf16 %v163_v9, %v162_v6  ;;  %v165_v14 = vld [vmem:[#allocation8 + $0x18] sm:$0xff]  ;;  %v636_v16 = vpack.c.bf16 %v87_v11, %v86_v10  ;;  %v80_v18 = vld [vmem:[#allocation3] sm:$0xff]  ;;  %vm341_vm2 = vcmask 1041409   ;;  %vm345_vm4 = vcmask 58368  }
  0x3b   :  { %v249_v7 = vsub.s32 0, %v932_v3  ;;  %v256_v15 = vsub.s32 1, %v932_v3  ;;  %634 = vmatpush3.bf16.msra.mxu0 %v633_v8  ;;  %v642_v17 = vpack.c.bf16 %v165_v14, %v164_v13  ;;  %v939_v19 = vld [vmem:[%s1022_s3] sm:$0x3]  ;;  %619 = vmatprep.mubr.msk.f32.mxu1 %vm88_vm1, %v80_v18  ;;  %v81_v23 = vld [vmem:[#allocation3 + $0x8] sm:$0xff]  ;;  %v273_v26 = vunpack.c.0.s8 %v272_v25 }
  0x3c   :  { %635 = vmatprep.subr.bf16.mxu0 %v811_v0  ;;  %639 = vmatprep.subr.bf16.mxu1 %v638_v12  ;;  %v79_v22 = vld [vmem:[%s1019_s0] sm:$0x3]  ;;  %v335_v57 = vsub.s32 %v332_v54, %v932_v3  ;;  %vm383_vm5 = vcmask 64512  }
  0x3d   :  { %v250_v20 = vrot.slane %v939_v19, %v249_v7  ;;  %641 = vmatpush3.bf16.msra.mxu1 %v638_v12  ;;  %v257_v21 = vrot.slane %v939_v19, %v256_v15  ;;  %v952_v27 = vsub.s32 %v273_v26, %v932_v3  ;;  %v581_v32 = vld [vmem:[%s1025_s6] ss:$0 sm:$0xff] }
  0x3e   :  { %643 = vmatprep.subr.bf16.mxu1 %v642_v17  ;;  %v582_v47 = vld [vmem:[%s1026_s7] ss:$0 sm:$0xff] }
  0x3f   :  { %252 = vbcast.lane.b32.xlu0 %v250_v20, 256  ;;  %637 = vmatpush3.bf16.msra.mxu0 %v636_v16  ;;  %v82_v60 = vld [vmem:[%s1021_s2] sm:$0x3]  ;;  %s815_s2 = smov [#allocation10]  }
  0x40   :  { %622 = vmatprep.subr.mxu0 %v813_v1  ;;  %vm328_vm3 = vcmp.gt.f32.partialorder %v82_v60, 0.0  ;;  %s551_s8 = sshll.u32 %s815_s2, 4  ;;  %s552_s8 = int_to_ptr.vmem [resolvable:$true] %s551_s8 }
  0x41   :  { %645 = vmatpush3.bf16.msra.mxu1 %v642_v17  ;;  %s732_s4 = scalar_lea.vmem %s552_s8, 32  ;;  %p737_p11 = scmp.lt.s32.totalorder %s552_s8, %s552_s8 }
  0x42   :  { %609 = vmatmul.mubr.msk.f32.vlgmr.msra.gmra.mrb[0].mxu0 %vm88_vm1, %v79_v22  ;;  %627 = vmatprep.subr.mxu1 %v813_v1  ;;  %p733_p10 = scmp.ne.s32.totalorder %s552_s8, %s732_s4  ;;  %p738_p12 = scmp.lt.s32.totalorder %s732_s4, %s732_s4 }
  0x43   :  { %259 = vbcast.lane.b32.xlu0 %v257_v21, 256  ;;  %623 = vmatpush3.msra.mxu0 %v80_v18 }
  0x44   :  { %620 = vmatmul.mubr.msk.f32.vlgmr.msra.gmra.mrb[0].mxu1 %vm88_vm1, %v81_v23  ;;  %624 = vmatprep.mubr.msk.f32.mxu0 %vm812_vm0, %v813_v1  ;;  %p739_p13 = por %p738_p12, %p737_p11 }
  0x45   :  { %628 = vmatpush3.msra.mxu1 %v81_v23  ;;  %629 = vmatprep.mubr.msk.f32.mxu1 %vm812_vm0, %v813_v1 }
  0x46   :  { %p740_p0 = pnand %p739_p13, %p733_p10 }
  0xb1   :  { %v253_v28 = vpop.permute.xlu0 %252 }
  0xb2   :  { %v268_v38 = vmul.f32 %v581_v32, %v253_v28 }
  0xb5   :  { %v260_v37 = vpop.permute.xlu0 %259 }
  0xb6   :  { %v269_v43 = vmul.f32 %v581_v32, %v260_v37 }
 0x115   :  { %v158_v29 = vpop.f32.mrb[0].mxu0 }
 0x116   :  { %v277_v30 = vrot.slane %v158_v29, %v952_v27  ;;  %v610_v31 = vpop.f32.mrb[1].mxu0 }
 0x117   :  { %v621_v33 = vpop.f32.mrb[0].mxu1 }
 0x118   :  { %v278_v34 = vcombine.high %v277_v30, %v277_v30  ;;  %v285_v35 = vrot.slane %v277_v30, %v952_v27  ;;  %v238_v36 = vpop.f32.mrb[1].mxu1 }
 0x11a   :  { %v292_v39 = vrot.slane %v278_v34, %v952_v27  ;;  %v296_v40 = vrot.slane %v285_v35, %v249_v7 }
 0x11c   :  { %v300_v41 = vrot.slane %v292_v39, %v249_v7  ;;  %v303_v42 = vadd.f32 %v296_v40, %v238_v36 }
 0x11e   :  { %v304_v44 = vadd.f32 %v621_v33, %v300_v41  ;;  %v305_v45 = vadd.f32 %v303_v42, %v268_v38 }
 0x120   :  { %658 = vtanh.f32 %v305_v45  ;;  %v306_v46 = vadd.f32 %v304_v44, %v269_v43 }
 0x122   :  { %660 = vtanh.f32 %v306_v46 }
 0x12a   :  { %v659_v48 = vpop.eup %658 }
 0x12b   :  { %v316_v49 = vmul.f32 %v659_v48, %v582_v47 }
 0x12c   :  { %v661_v50 = vpop.eup %660 }
 0x12d   :  { %v318_v51 = vsel %vm88_vm1, %v316_v49, 0.0  ;;  %v317_v52 = vmul.f32 %v661_v50, %v582_v47 }
 0x12e   :  { %319 = vadd.xlane.f32.xlu1 %v318_v51 }
 0x12f   :  { %v321_v53 = vsel %vm88_vm1, %v317_v52, 0.0 }
 0x132   :  { %322 = vadd.xlane.f32.xlu1 %v321_v53 }
 0x1bb   :  { %v320_v56 = vpop.xlane.xlu1 %319 }
 0x1bc   :  { %v326_v58 = vadd.f32 %v325_v55, %v320_v56 }
 0x1be   :  { %v336_v62 = vrot.slane %v326_v58, %v335_v57 }
 0x1bf   :  { %v323_v59 = vpop.xlane.xlu1 %322 }
 0x1c0   :  { %v327_v61 = vadd.f32 %v325_v55, %v323_v59 }
 0x1c2   :  { %v340_v63 = vrot.slane %v327_v61, %v335_v57 }
 0x1c4   :  { %v342_v0 = vsel %vm341_vm2, %v340_v63, %v336_v62 }
 0x1c5   :  { %v344_v1 = vsel %vm328_vm3, %v342_v0, -1e+18 }
 0x1c6   :  { %v346_v2 = vsel %vm345_vm4, %v344_v1, -inf }
 0x1c7   :  { %347 = vmax.xlane.f32.xlu0 %v346_v2 }
 0x254   :  { %v348_v4 = vpop.xlane.xlu0 %347 }
 0x255   :  { %v349_v3 = vsub.f32 %v344_v1, %v348_v4 }
 0x257   :  { %v350_v5 = vmul.f32 1.442695, %v349_v3 }
 0x259   :  { %662 = vpow2.f32 %v350_v5 }
 0x263   :  { %v663_v6 = vpop.eup %662 }
 0x264   :  { %v352_v7 = vsel %vm345_vm4, %v663_v6, 0.0 }
 0x265   :  { %353 = vadd.xlane.f32.xlu1 %v352_v7 }
 0x2f2   :  { %v354_v8 = vpop.xlane.xlu1 %353 }
 0x2f3   :  { %664 = vrcp.f32 %v354_v8 }
 0x2fd   :  { %v665_v9 = vpop.eup %664 }
 0x2fe   :  { %v356_v10 = vmul.f32 %v665_v9, %v663_v6 }
 0x300   :  { %357 = vst.msk [vmem:[#allocation10] sm:$0x3] %vm345_vm4, %v356_v10  ;;  %v367_v11 = vrot.slane %v356_v10, %v952_v27  ;;  %v358_v12 = vadd.f32 %v356_v10, %v939_v19 }
 0x302   :  { %v375_v13 = vrot.slane %v367_v11, %v952_v27  ;;  %v368_v14 = vcombine.high %v367_v11, %v367_v11  ;;  %359 = vst.msk [vmem:[#allocation12] sm:$0x3] %vm345_vm4, %v358_v12 }
 0x304   :  { %625 = vmatmul.mubr.msk.f32.vlgmr.msra.gmra.mrb[2].mxu0 %vm383_vm5, %v375_v13  ;;  %v382_v15 = vrot.slane %v368_v14, %v952_v27 }
 0x306   :  { %630 = vmatmul.mubr.msk.f32.vlgmr.msra.gmra.mrb[2].mxu1 %vm383_vm5, %v382_v15 }
 0x307   :  { %743 = shalt.err (!%p740_p0)
}
 0x308   :  { %s744_s25 = scalar_lea.hbm %s1029_s10, 32 }
 0x309   :  { %p745_p1 = scmp.ne.s32.totalorder %s1029_s10, %s744_s25  ;;  %p748_p2 = scmp.lt.u32.totalorder %s744_s25, %s1029_s10 }
 0x30b   :  { %p750_p3 = pnand %p748_p2, %p745_p1 }
 0x30d   :  { %753 = shalt.err (!%p750_p3)
}
 0x30e   :  { %554 = dma.vmem_to_hbm [thread:$0]  %s552_s8, 32, %s1029_s10, [#allocation11]  }
 0x30f   :  { %s816_s15 = smov [#allocation12]  }
 0x310   :  { %s561_s16 = sshll.u32 %s816_s15, 4  ;;  %s562_s16 = int_to_ptr.vmem [resolvable:$true] %s561_s16 }
 0x311   :  { %s754_s1 = scalar_lea.vmem %s562_s16, 32  ;;  %p759_p5 = scmp.lt.s32.totalorder %s562_s16, %s562_s16 }
 0x312   :  { %p755_p4 = scmp.ne.s32.totalorder %s562_s16, %s754_s1  ;;  %p760_p6 = scmp.lt.s32.totalorder %s754_s1, %s754_s1 }
 0x314   :  { %p761_p7 = por %p760_p6, %p759_p5 }
 0x316   :  { %p762_p8 = pnand %p761_p7, %p755_p4 }
 0x318   :  { %765 = shalt.err (!%p762_p8)
}
 0x319   :  { %s766_s29 = scalar_lea.hbm %s1030_s11, 32 }
 0x31a   :  { %p767_p9 = scmp.ne.s32.totalorder %s1030_s11, %s766_s29  ;;  %p770_p10 = scmp.lt.u32.totalorder %s766_s29, %s1030_s11 }
 0x31c   :  { %p772_p11 = pnand %p770_p10, %p767_p9 }
 0x31e   :  { %775 = shalt.err (!%p772_p11)
}
 0x31f   :  { %564 = dma.vmem_to_hbm [thread:$0]  %s562_s16, 32, %s1030_s11, [#allocation11]   ;;  %vm533_vm6 = vcmask 254976  }
 0x320   :  { %s817_s6 = smov [#allocation9]  }
 0x321   :  { %s541_s21 = sshll.u32 %s817_s6, 4  ;;  %s542_s21 = int_to_ptr.vmem [resolvable:$true] %s541_s21 }
 0x322   :  { %s776_s22 = scalar_lea.vmem %s542_s21, 32  ;;  %p781_p13 = scmp.lt.s32.totalorder %s542_s21, %s542_s21 }
 0x323   :  { %p777_p12 = scmp.ne.s32.totalorder %s542_s21, %s776_s22  ;;  %p782_p0 = scmp.lt.s32.totalorder %s776_s22, %s776_s22 }
 0x325   :  { %p783_p1 = por %p782_p0, %p781_p13 }
 0x327   :  { %p784_p2 = pnand %p783_p1, %p777_p12 }
 0x3d7   :  { %v452_v16 = vpop.f32.mrb[2].mxu0 }
 0x3d8   :  { %v626_v17 = vpop.f32.mrb[3].mxu0 }
 0x3d9   :  { %v524_v18 = vpop.f32.mrb[2].mxu1 }
 0x3da   :  { %v530_v19 = vrot.slane %v524_v18, 7  ;;  %v631_v20 = vpop.f32.mrb[3].mxu1 }
 0x3dc   :  { %v531_v21 = vsel %vm341_vm2, %v530_v19, %v452_v16 }
 0x3dd   :  { %534 = vst.msk [vmem:[#allocation9] sm:$0x3] %vm533_vm6, %v531_v21 }
 0x3de   :  { %787 = shalt.err (!%p784_p2)
}
 0x3df   :  { %s788_s23 = scalar_lea.hbm %s1028_s9, 32 }
 0x3e0   :  { %p789_p3 = scmp.ne.s32.totalorder %s1028_s9, %s788_s23  ;;  %p792_p4 = scmp.lt.u32.totalorder %s788_s23, %s1028_s9 }
 0x3e2   :  { %p794_p5 = pnand %p792_p4, %p789_p3 }
 0x3e4   :  { %797 = shalt.err (!%p794_p5)
}
 0x3e5   :  { %544 = dma.vmem_to_hbm [thread:$0]  %s542_s21, 32, %s1028_s9, [#allocation5]  }
 0x3e6   :  { %802 = dma.done.wait [#allocation5], 32  }
 0x3e7   :  { %803 = vsyncadd [#allocation5], 4294967264 }
 0x3e8   :  { %804 = dma.done.wait [#allocation11], 64  }
 0x3e9   :  { %805 = vsyncadd [#allocation11], 4294967232 }
 0x3ea   :  { %574 = vsyncpa [#allocation4], 1 }
 0x3eb   :  { %575 = vsyncpa [#allocation7], 1 }
 0x3ec   :  { %576 = vsyncpa [#allocation5], 1 }
 0x3ed   :  { %577 = vsyncpa [#allocation11], 1 }

</bundles_post_ra>
